<compile_context>
chip_gen: v6e
topology: v6e:2x2x1
jax: 0.10.0
libtpu: 0.0.40
codegen_flags: <defaults>
</compile_context>

<pallas_src>
import jax
import jax.numpy as jnp
from jax.experimental import pallas as pl
from jax.experimental.pallas import tpu as pltpu

LN_EPS = 1e-5  # torch.nn.LayerNorm default eps


def _make_featurizer_kernel(num_layers):
    """Kernel: per-layer LayerNorm (no affine) + softmax-weighted sum.

    Args (as refs):
      w_ref:            (L,) float32 in SMEM (already softmax-normalized)
      feat_ref_0..L-1:  (blk, C) VMEM blocks, one per layer
      out_ref:          (blk, C) VMEM block
    """

    def kernel(w_ref, *refs):
        feat_refs = refs[:num_layers]
        out_ref = refs[num_layers]
        acc = None
        for l in range(num_layers):  # static, unrolled (L is small/moderate)
            x = feat_refs[l][...].astype(jnp.float32)
            mean = jnp.mean(x, axis=-1, keepdims=True)
            xc = x - mean
            var = jnp.mean(xc * xc, axis=-1, keepdims=True)  # biased (torch LN)
            # Fold the layer weight into the per-row normalization scale:
            # one (blk,1) column, saves a full blk x C multiply per layer.
            scale = w_ref[l] * jax.lax.rsqrt(var + LN_EPS)
            contrib = xc * scale
            acc = contrib if acc is None else acc + contrib
        out_ref[...] = acc.astype(out_ref.dtype)

    return kernel


def featurizer_forward(features, weights, *, block_rows=None,
                       vmem_budget_bytes=40 * 1024 * 1024):
    """features: list of L arrays [B, T, C]; weights: [L] layer logits."""
    L = len(features)
    B, T, C = features[0].shape
    BT = B * T
    dtype = features[0].dtype
    itemsize = int(jnp.dtype(dtype).itemsize)

    # Free reshape (merge of contiguous leading dims -> no HBM copy), unlike
    # the previous jnp.stack + jnp.pad glue.
    feats2d = [f.reshape(BT, C) for f in features]

    norm_w = jax.nn.softmax(weights.astype(jnp.float32), axis=-1)

    # ---- row-tile selection -------------------------------------------------
    # Double-buffered working set per row of the tile:
    #   inputs : 2 * L * C * itemsize   (L layer blocks, double-buffered)
    #   output : 2 *     C * itemsize
    if block_rows is None:
        per_row_bytes = 2 * (L + 1) * C * itemsize
        blk = vmem_budget_bytes // per_row_bytes
        blk = int(min(blk, 1024))
        blk = max(8, (blk // 8) * 8)           # sublane multiple of 8
    else:
        blk = max(8, (int(block_rows) // 8) * 8)
    # A block equal to the full row extent is always legal, even if BT % 8 != 0.
    blk = min(blk, BT)

    work_bytes = 2 * (L + 1) * blk * C * itemsize
    vmem_limit = int(min(max(work_bytes + (8 << 20), 32 << 20), 56 << 20))

    grid = (pl.cdiv(BT, blk),)  # ragged tail: last block clipped/masked by Pallas

    in_specs = [pl.BlockSpec(memory_space=pltpu.MemorySpace.SMEM)]          # norm_w
    in_specs += [pl.BlockSpec((blk, C), lambda i: (i, 0)) for _ in range(L)]  # layers
    out_specs = pl.BlockSpec((blk, C), lambda i: (i, 0))

    # NOTE: C is kept un-tiled on the lane axis (LayerNorm reduces over it).
    # Real configs (C=768/1024) are lane-dense; the fbank branch (C=240) or
    # toy C=32 would hit masked partial stores.
    out = pl.pallas_call(
        _make_featurizer_kernel(L),
        out_shape=jax.ShapeDtypeStruct((BT, C), dtype),
        grid_spec=pltpu.PrefetchScalarGridSpec(
            num_scalar_prefetch=0,
            grid=grid,
            in_specs=in_specs,
            out_specs=out_specs,
        ),
        compiler_params=pltpu.CompilerParams(
            dimension_semantics=("parallel",),   # megacore shards the row grid
            vmem_limit_bytes=vmem_limit,
        ),
    )(norm_w, *feats2d)

    return out.reshape(B, T, C)


def featurizer_ref(features, weights):
    """Pure-JAX reference mirroring the PyTorch forward (f32 math)."""
    feat = jnp.stack([f.astype(jnp.float32) for f in features], axis=0)  # [L,B,T,C]
    mean = feat.mean(-1, keepdims=True)
    var = ((feat - mean) ** 2).mean(-1, keepdims=True)
    y = (feat - mean) * jax.lax.rsqrt(var + LN_EPS)          # LayerNorm, no affine
    w = jax.nn.softmax(weights.astype(jnp.float32))
    return jnp.einsum("l,lbtc->btc", w, y)


# TODO(synk): the type=='DNN' and fbank (upstream_dim==240) config branches of
# Featurizer are alternative configurations and are not implemented here.
# TODO(synk): for very large L (e.g. 25 layers x 1024 dims) a layer-streaming
# variant (manual double-buffered DMA with L as an in-kernel reduction so only
# one layer tile is VMEM-resident) would allow blk=1024 on every generation.

if __name__ == "__main__":
    # ---- Test 1: fp32, small shapes, single full block ----------------------
    key = jax.random.PRNGKey(0)
    L, B, T, C = 4, 2, 8, 32  # layer_num, batch, frames, upstream_dim
    keys = jax.random.split(key, L)
    features = [jax.random.normal(k, (B, T, C), dtype=jnp.float32) for k in keys]
    weights = jnp.zeros((L,), dtype=jnp.float32)  # nn.Parameter(torch.zeros(L))

    out = jax.block_until_ready(featurizer_forward(features, weights))
    ref = featurizer_ref(features, weights)
    assert out.shape == (B, T, C), out.shape
    assert jnp.allclose(out, ref, atol=1e-4, rtol=1e-4), "mismatch vs reference (fp32)"

    # ---- Test 2: ragged B*T (not a multiple of the tile) exercises the cdiv
    # grid / masked last block -------------------------------------------------
    L2, B2, T2, C2 = 3, 2, 5, 128
    keys2 = jax.random.split(jax.random.PRNGKey(1), L2 + 1)
    features2 = [jax.random.normal(k, (B2, T2, C2), dtype=jnp.float32)
                 for k in keys2[:L2]]
    weights2 = jax.random.normal(keys2[L2], (L2,), dtype=jnp.float32)
    out2 = jax.block_until_ready(
        featurizer_forward(features2, weights2, block_rows=8))
    ref2 = featurizer_ref(features2, weights2)
    assert jnp.allclose(out2, ref2, atol=1e-4, rtol=1e-4), "mismatch (ragged)"

    # ---- Test 3: bf16 features stay bf16 in HBM; LN math in f32 -------------
    features3 = [f.astype(jnp.bfloat16) for f in features2]
    out3 = jax.block_until_ready(
        featurizer_forward(features3, weights2, block_rows=8))
    assert out3.dtype == jnp.bfloat16
    ref3 = featurizer_ref(features3, weights2)
    assert jnp.allclose(out3.astype(jnp.float32), ref3, atol=3e-2, rtol=3e-2), \
        "mismatch (bf16)"

    print("KERNEL_OK")
</pallas_src>

<mosaic_0001>
module attributes {stable_mosaic.version = 11 : i64} {
  func.func @kernel(%arg0: i32, %arg1: memref<4xf32, #tpu.memory_space<smem>>, %arg2: memref<16x32xf32, #tpu.memory_space<vmem>>, %arg3: memref<16x32xf32, #tpu.memory_space<vmem>>, %arg4: memref<16x32xf32, #tpu.memory_space<vmem>>, %arg5: memref<16x32xf32, #tpu.memory_space<vmem>>, %arg6: memref<16x32xf32, #tpu.memory_space<vmem>>) attributes {dimension_semantics = [#tpu.dimension_semantics<parallel>], iteration_bounds = array<i64: 1>, scalar_prefetch = 0 : i64, scratch_operands = 0 : i64, tpu.core_type = #tpu.core_type<tc>, window_params = [{transform_indices = @transform_0, window_bounds = array<i64: 4>}, {transform_indices = @transform_1, window_bounds = array<i64: 16, 32>}, {transform_indices = @transform_2, window_bounds = array<i64: 16, 32>}, {transform_indices = @transform_3, window_bounds = array<i64: 16, 32>}, {transform_indices = @transform_4, window_bounds = array<i64: 16, 32>}, {transform_indices = @transform_5, window_bounds = array<i64: 16, 32>}]} {
    %c0 = arith.constant 0 : index
    %c0_0 = arith.constant 0 : index
    %0 = vector.load %arg2[%c0, %c0_0] : memref<16x32xf32, #tpu.memory_space<vmem>>, vector<16x32xf32>
    %cst = arith.constant dense<0.000000e+00> : vector<16xf32>
    %1 = vector.multi_reduction <add>, %0, %cst [1] : vector<16x32xf32> to vector<16xf32>
    %2 = vector.shape_cast %1 : vector<16xf32> to vector<16x1xf32>
    %cst_1 = arith.constant 3.200000e+01 : f32
    %3 = vector.broadcast %cst_1 : f32 to vector<16x1xf32>
    %4 = arith.divf %2, %3 : vector<16x1xf32>
    %5 = vector.broadcast %4 : vector<16x1xf32> to vector<16x32xf32>
    %6 = arith.subf %0, %5 : vector<16x32xf32>
    %7 = arith.mulf %6, %6 : vector<16x32xf32>
    %cst_2 = arith.constant dense<0.000000e+00> : vector<16xf32>
    %8 = vector.multi_reduction <add>, %7, %cst_2 [1] : vector<16x32xf32> to vector<16xf32>
    %9 = vector.shape_cast %8 : vector<16xf32> to vector<16x1xf32>
    %cst_3 = arith.constant 3.200000e+01 : f32
    %10 = vector.broadcast %cst_3 : f32 to vector<16x1xf32>
    %11 = arith.divf %9, %10 : vector<16x1xf32>
    %c0_4 = arith.constant 0 : index
    %12 = memref.load %arg1[%c0_4] : memref<4xf32, #tpu.memory_space<smem>>
    %cst_5 = arith.constant 9.99999974E-6 : f32
    %13 = vector.broadcast %cst_5 : f32 to vector<16x1xf32>
    %14 = arith.addf %11, %13 : vector<16x1xf32>
    %15 = math.rsqrt %14 : vector<16x1xf32>
    %16 = vector.broadcast %12 : f32 to vector<16x1xf32>
    %17 = arith.mulf %16, %15 : vector<16x1xf32>
    %18 = vector.broadcast %17 : vector<16x1xf32> to vector<16x32xf32>
    %19 = arith.mulf %6, %18 : vector<16x32xf32>
    %c0_6 = arith.constant 0 : index
    %c0_7 = arith.constant 0 : index
    %20 = vector.load %arg3[%c0_6, %c0_7] : memref<16x32xf32, #tpu.memory_space<vmem>>, vector<16x32xf32>
    %cst_8 = arith.constant dense<0.000000e+00> : vector<16xf32>
    %21 = vector.multi_reduction <add>, %20, %cst_8 [1] : vector<16x32xf32> to vector<16xf32>
    %22 = vector.shape_cast %21 : vector<16xf32> to vector<16x1xf32>
    %cst_9 = arith.constant 3.200000e+01 : f32
    %23 = vector.broadcast %cst_9 : f32 to vector<16x1xf32>
    %24 = arith.divf %22, %23 : vector<16x1xf32>
    %25 = vector.broadcast %24 : vector<16x1xf32> to vector<16x32xf32>
    %26 = arith.subf %20, %25 : vector<16x32xf32>
    %27 = arith.mulf %26, %26 : vector<16x32xf32>
    %cst_10 = arith.constant dense<0.000000e+00> : vector<16xf32>
    %28 = vector.multi_reduction <add>, %27, %cst_10 [1] : vector<16x32xf32> to vector<16xf32>
    %29 = vector.shape_cast %28 : vector<16xf32> to vector<16x1xf32>
    %cst_11 = arith.constant 3.200000e+01 : f32
    %30 = vector.broadcast %cst_11 : f32 to vector<16x1xf32>
    %31 = arith.divf %29, %30 : vector<16x1xf32>
    %c1 = arith.constant 1 : index
    %32 = memref.load %arg1[%c1] : memref<4xf32, #tpu.memory_space<smem>>
    %cst_12 = arith.constant 9.99999974E-6 : f32
    %33 = vector.broadcast %cst_12 : f32 to vector<16x1xf32>
    %34 = arith.addf %31, %33 : vector<16x1xf32>
    %35 = math.rsqrt %34 : vector<16x1xf32>
    %36 = vector.broadcast %32 : f32 to vector<16x1xf32>
    %37 = arith.mulf %36, %35 : vector<16x1xf32>
    %38 = vector.broadcast %37 : vector<16x1xf32> to vector<16x32xf32>
    %39 = arith.mulf %26, %38 : vector<16x32xf32>
    %40 = arith.addf %19, %39 : vector<16x32xf32>
    %c0_13 = arith.constant 0 : index
    %c0_14 = arith.constant 0 : index
    %41 = vector.load %arg4[%c0_13, %c0_14] : memref<16x32xf32, #tpu.memory_space<vmem>>, vector<16x32xf32>
    %cst_15 = arith.constant dense<0.000000e+00> : vector<16xf32>
    %42 = vector.multi_reduction <add>, %41, %cst_15 [1] : vector<16x32xf32> to vector<16xf32>
    %43 = vector.shape_cast %42 : vector<16xf32> to vector<16x1xf32>
    %cst_16 = arith.constant 3.200000e+01 : f32
    %44 = vector.broadcast %cst_16 : f32 to vector<16x1xf32>
    %45 = arith.divf %43, %44 : vector<16x1xf32>
    %46 = vector.broadcast %45 : vector<16x1xf32> to vector<16x32xf32>
    %47 = arith.subf %41, %46 : vector<16x32xf32>
    %48 = arith.mulf %47, %47 : vector<16x32xf32>
    %cst_17 = arith.constant dense<0.000000e+00> : vector<16xf32>
    %49 = vector.multi_reduction <add>, %48, %cst_17 [1] : vector<16x32xf32> to vector<16xf32>
    %50 = vector.shape_cast %49 : vector<16xf32> to vector<16x1xf32>
    %cst_18 = arith.constant 3.200000e+01 : f32
    %51 = vector.broadcast %cst_18 : f32 to vector<16x1xf32>
    %52 = arith.divf %50, %51 : vector<16x1xf32>
    %c2 = arith.constant 2 : index
    %53 = memref.load %arg1[%c2] : memref<4xf32, #tpu.memory_space<smem>>
    %cst_19 = arith.constant 9.99999974E-6 : f32
    %54 = vector.broadcast %cst_19 : f32 to vector<16x1xf32>
    %55 = arith.addf %52, %54 : vector<16x1xf32>
    %56 = math.rsqrt %55 : vector<16x1xf32>
    %57 = vector.broadcast %53 : f32 to vector<16x1xf32>
    %58 = arith.mulf %57, %56 : vector<16x1xf32>
    %59 = vector.broadcast %58 : vector<16x1xf32> to vector<16x32xf32>
    %60 = arith.mulf %47, %59 : vector<16x32xf32>
    %61 = arith.addf %40, %60 : vector<16x32xf32>
    %c0_20 = arith.constant 0 : index
    %c0_21 = arith.constant 0 : index
    %62 = vector.load %arg5[%c0_20, %c0_21] : memref<16x32xf32, #tpu.memory_space<vmem>>, vector<16x32xf32>
    %cst_22 = arith.constant dense<0.000000e+00> : vector<16xf32>
    %63 = vector.multi_reduction <add>, %62, %cst_22 [1] : vector<16x32xf32> to vector<16xf32>
    %64 = vector.shape_cast %63 : vector<16xf32> to vector<16x1xf32>
    %cst_23 = arith.constant 3.200000e+01 : f32
    %65 = vector.broadcast %cst_23 : f32 to vector<16x1xf32>
    %66 = arith.divf %64, %65 : vector<16x1xf32>
    %67 = vector.broadcast %66 : vector<16x1xf32> to vector<16x32xf32>
    %68 = arith.subf %62, %67 : vector<16x32xf32>
    %69 = arith.mulf %68, %68 : vector<16x32xf32>
    %cst_24 = arith.constant dense<0.000000e+00> : vector<16xf32>
    %70 = vector.multi_reduction <add>, %69, %cst_24 [1] : vector<16x32xf32> to vector<16xf32>
    %71 = vector.shape_cast %70 : vector<16xf32> to vector<16x1xf32>
    %cst_25 = arith.constant 3.200000e+01 : f32
    %72 = vector.broadcast %cst_25 : f32 to vector<16x1xf32>
    %73 = arith.divf %71, %72 : vector<16x1xf32>
    %c3 = arith.constant 3 : index
    %74 = memref.load %arg1[%c3] : memref<4xf32, #tpu.memory_space<smem>>
    %cst_26 = arith.constant 9.99999974E-6 : f32
    %75 = vector.broadcast %cst_26 : f32 to vector<16x1xf32>
    %76 = arith.addf %73, %75 : vector<16x1xf32>
    %77 = math.rsqrt %76 : vector<16x1xf32>
    %78 = vector.broadcast %74 : f32 to vector<16x1xf32>
    %79 = arith.mulf %78, %77 : vector<16x1xf32>
    %80 = vector.broadcast %79 : vector<16x1xf32> to vector<16x32xf32>
    %81 = arith.mulf %68, %80 : vector<16x32xf32>
    %82 = arith.addf %61, %81 : vector<16x32xf32>
    %c0_27 = arith.constant 0 : index
    %c0_28 = arith.constant 0 : index
    %83 = vector.load %arg6[%c0_27, %c0_28] : memref<16x32xf32, #tpu.memory_space<vmem>>, vector<16x32xf32>
    tpu.vector_store %arg6[%c0_27, %c0_28], %82 {strides = array<i32>} : memref<16x32xf32, #tpu.memory_space<vmem>>, vector<16x32xf32>,
    return
  }
  func.func @transform_0(%arg0: i32) -> i32 {
    %c0_i32 = arith.constant 0 : i32
    %c0_i32_0 = arith.constant 0 : i32
    return %c0_i32 : i32
  }
  func.func @transform_1(%arg0: i32) -> (i32, i32) {
    %c0_i32 = arith.constant 0 : i32
    %c0_i32_0 = arith.constant 0 : i32
    return %arg0, %c0_i32 : i32, i32
  }
  func.func @transform_2(%arg0: i32) -> (i32, i32) {
    %c0_i32 = arith.constant 0 : i32
    %c0_i32_0 = arith.constant 0 : i32
    return %arg0, %c0_i32 : i32, i32
  }
  func.func @transform_3(%arg0: i32) -> (i32, i32) {
    %c0_i32 = arith.constant 0 : i32
    %c0_i32_0 = arith.constant 0 : i32
    return %arg0, %c0_i32 : i32, i32
  }
  func.func @transform_4(%arg0: i32) -> (i32, i32) {
    %c0_i32 = arith.constant 0 : i32
    %c0_i32_0 = arith.constant 0 : i32
    return %arg0, %c0_i32 : i32, i32
  }
  func.func @transform_5(%arg0: i32) -> (i32, i32) {
    %c0_i32 = arith.constant 0 : i32
    %c0_i32_0 = arith.constant 0 : i32
    return %arg0, %c0_i32 : i32, i32
  }
}

</mosaic_0001>

<bundles_post_ra>
// kernel: tpu_custom_call.1
= control target key start
LH: loop header
LB: loop body
LE: loop exit
PB: predicated region body
PF: predicated region fallthrough
CT: control target
= control target key end

     0   :  { %10 = vsyncpa [#allocation5], 0  ;;  %s519_s0 = inlined_call_operand.hbm [shape: f32[4], index: 0, kind: input, shape index: {}]   ;;  %s520_s1 = inlined_call_operand.hbm [shape: f32[16,32], index: 1, kind: input, shape index: {}]   ;;  %s521_s2 = inlined_call_operand.hbm [shape: f32[16,32], index: 2, kind: input, shape index: {}]   ;;  %s522_s3 = inlined_call_operand.hbm [shape: f32[16,32], index: 3, kind: input, shape index: {}]   ;;  %s523_s4 = inlined_call_operand.hbm [shape: f32[16,32], index: 4, kind: input, shape index: {}]   ;;  %s524_s5 = inlined_call_operand.hbm [shape: f32[16,32], index: 5, kind: output, shape index: {}]  }
   0x1   :  { %11 = vsyncpa [#allocation3], 0 }
   0x2   :  { %12 = vsyncpa [#allocation8], 0 }
   0x3   :  { %13 = vsyncpa [#allocation11], 0 }
   0x4   :  { %14 = vsyncpa [#allocation4], 0  ;;  %s390_s18 = smov [#allocation7]   ;;  %s391_s20 = smov [#allocation6]  }
   0x5   :  { %s40_s19 = sshll.u32 %s390_s18, 4  ;;  %s28_s21 = sshll.u32 %s391_s20, 4  ;;  %s41_s19 = int_to_ptr.vmem [resolvable:$true] %s40_s19  ;;  %s29_s21 = int_to_ptr.vmem [resolvable:$true] %s28_s21 }
   0x6   :  { %s280_s22 = scalar_lea.vmem %s41_s19, 256  ;;  %p285_p1 = scmp.lt.s32.totalorder %s41_s19, %s41_s19 }
   0x7   :  { %p281_p0 = scmp.ne.s32.totalorder %s41_s19, %s280_s22  ;;  %p286_p2 = scmp.lt.s32.totalorder %s280_s22, %s280_s22 }
   0x9   :  { %p287_p3 = por %p286_p2, %p285_p1 }
   0xb   :  { %p288_p4 = pnand %p287_p3, %p281_p0 }
   0xd   :  { %291 = shalt.err (!%p288_p4)
}
   0xe   :  { %s392_s23 = smov 128   ;;  %s393_s24 = smov 8  }
   0xf   :  { %46 = dma.hbm_to_vmem [thread:$0]  %s521_s2, 256, %s41_s19, [#allocation8], %s392_s23, %s392_s23, %s393_s24  }
  0x10   :  { %s394_s27 = smov [#allocation2]   ;;  %s308_s30 = scalar_lea.vmem %s29_s21, 256 }
  0x11   :  { %22 = dma.hbm_to_smem %s519_s0, 16, %s394_s27, [#allocation5]  }
  0x12   :  { %p309_p5 = scmp.ne.s32.totalorder %s29_s21, %s308_s30  ;;  %p313_p6 = scmp.lt.s32.totalorder %s29_s21, %s29_s21 }
  0x13   :  { %p314_p7 = scmp.lt.s32.totalorder %s308_s30, %s308_s30 }
  0x15   :  { %p315_p8 = por %p314_p7, %p313_p6 }
  0x17   :  { %p316_p9 = pnand %p315_p8, %p309_p5 }
  0x19   :  { %319 = shalt.err (!%p316_p9)
}
  0x1a   :  { %34 = dma.hbm_to_vmem [thread:$0]  %s520_s1, 256, %s29_s21, [#allocation3], %s392_s23, %s392_s23, %s393_s24  }
  0x1b   :  { %s395_s2 = smov [#allocation9]   ;;  %s396_s9 = smov [#allocation10]  }
  0x1c   :  { %s52_s8 = sshll.u32 %s395_s2, 4  ;;  %s64_s0 = sshll.u32 %s396_s9, 4  ;;  %s53_s8 = int_to_ptr.vmem [resolvable:$true] %s52_s8  ;;  %s65_s0 = int_to_ptr.vmem [resolvable:$true] %s64_s0 }
  0x1d   :  { %s328_s10 = scalar_lea.vmem %s53_s8, 256  ;;  %p333_p11 = scmp.lt.s32.totalorder %s53_s8, %s53_s8 }
  0x1e   :  { %p329_p10 = scmp.ne.s32.totalorder %s53_s8, %s328_s10  ;;  %p334_p12 = scmp.lt.s32.totalorder %s328_s10, %s328_s10 }
  0x20   :  { %p335_p13 = por %p334_p12, %p333_p11 }
  0x22   :  { %p336_p0 = pnand %p335_p13, %p329_p10 }
  0x24   :  { %339 = shalt.err (!%p336_p0)
}
  0x25   :  { %58 = dma.hbm_to_vmem [thread:$0]  %s522_s3, 256, %s53_s8, [#allocation8], %s392_s23, %s392_s23, %s393_s24  }
  0x26   :  { %s348_s1 = scalar_lea.vmem %s65_s0, 256  ;;  %p353_p2 = scmp.lt.s32.totalorder %s65_s0, %s65_s0 }
  0x27   :  { %p349_p1 = scmp.ne.s32.totalorder %s65_s0, %s348_s1  ;;  %p354_p3 = scmp.lt.s32.totalorder %s348_s1, %s348_s1 }
  0x29   :  { %p355_p4 = por %p354_p3, %p353_p2 }
  0x2b   :  { %p356_p5 = pnand %p355_p4, %p349_p1 }
  0x2d   :  { %359 = shalt.err (!%p356_p5)
}
  0x2e   :  { %70 = dma.hbm_to_vmem [thread:$0]  %s523_s4, 256, %s65_s0, [#allocation11], %s392_s23, %s392_s23, %s393_s24  }
  0x2f   :  { %380 = dma.done.wait [#allocation5], 16  }
  0x30   :  { %381 = vsyncadd [#allocation5], 4294967280 }
  0x31   :  { %382 = dma.done.wait [#allocation3], 256  }
  0x32   :  { %383 = vsyncadd [#allocation3], 4294967040 }
  0x33   :  { %384 = dma.done.wait [#allocation8], 512  }
  0x34   :  { %385 = vsyncadd [#allocation8], 4294966784 }
  0x35   :  { %386 = dma.done.wait [#allocation11], 256  }
  0x36   :  { %387 = vsyncadd [#allocation11], 4294967040 }
  0x37   :  { %86 = sfence }
  0x38   :  { %v87_v0 = vld [vmem:[#allocation6] sm:$0xff]  ;;  %vm89_vm0 = vcmask 261120   ;;  %v121_v1 = vld [vmem:[#allocation7] sm:$0xff]  ;;  %v88_v2 = vld [vmem:[#allocation6 + $0x8] sm:$0xff]  ;;  %s245_s3 = sld [smem:[#allocation2 + $0x1]]  ;;  %s397_s17 = smov [#allocation12]  }
  0x39   :  { %v90_v3 = vsel %vm89_vm0, %v87_v0, 0.0  ;;  %v123_v4 = vsel %vm89_vm0, %v121_v1, 0.0  ;;  %v122_v5 = vld [vmem:[#allocation7 + $0x8] sm:$0xff]  ;;  %v93_v6 = vsel %vm89_vm0, %v88_v2, 0.0  ;;  %v155_v8 = vld [vmem:[#allocation9] sm:$0xff]  ;;  %v156_v9 = vld [vmem:[#allocation9 + $0x8] sm:$0xff] }
  0x3a   :  { %91 = vadd.xlane.f32.xlu0 %v90_v3  ;;  %124 = vadd.xlane.f32.xlu1 %v123_v4  ;;  %v126_v7 = vsel %vm89_vm0, %v122_v5, 0.0  ;;  %v157_v10 = vsel %vm89_vm0, %v155_v8, 0.0  ;;  %v160_v11 = vsel %vm89_vm0, %v156_v9, 0.0  ;;  %v189_v12 = vld [vmem:[#allocation10] sm:$0xff]  ;;  %v190_v13 = vld [vmem:[#allocation10 + $0x8] sm:$0xff]  ;;  %s111_s4 = sld [smem:[#allocation2]] }
  0x3b   :  { %v191_v14 = vsel %vm89_vm0, %v189_v12, 0.0  ;;  %v194_v15 = vsel %vm89_vm0, %v190_v13, 0.0  ;;  %s246_s15 = sld [smem:[#allocation2 + $0x2]]  ;;  %s230_s18 = sshll.u32 %s397_s17, 4  ;;  %s231_s18 = int_to_ptr.vmem [resolvable:$true] %s230_s18 }
  0x3c   :  { %s247_s16 = sld [smem:[#allocation2 + $0x3]]  ;;  %s360_s19 = scalar_lea.vmem %s231_s18, 256 }
  0x3d   :  { %p361_p6 = scmp.ne.s32.totalorder %s231_s18, %s360_s19  ;;  %p365_p7 = scmp.lt.s32.totalorder %s231_s18, %s231_s18 }
  0x3e   :  { %94 = vadd.xlane.f32.xlu0 %v93_v6  ;;  %127 = vadd.xlane.f32.xlu1 %v126_v7  ;;  %p366_p8 = scmp.lt.s32.totalorder %s360_s19, %s360_s19 }
  0x40   :  { %p367_p9 = por %p366_p8, %p365_p7 }
  0x42   :  { %158 = vadd.xlane.f32.xlu0 %v157_v10  ;;  %161 = vadd.xlane.f32.xlu1 %v160_v11  ;;  %p368_p10 = pnand %p367_p9, %p361_p6 }
  0x46   :  { %192 = vadd.xlane.f32.xlu0 %v191_v14  ;;  %195 = vadd.xlane.f32.xlu1 %v194_v15 }
  0xc3   :  { %v92_v16 = vpop.xlane.xlu0 %91  ;;  %v125_v17 = vpop.xlane.xlu1 %124 }
  0xc4   :  { %v97_v18 = vmul.f32 0.03125, %v92_v16  ;;  %v129_v19 = vmul.f32 0.03125, %v125_v17  ;;  %v148_v16 = vstv %s245_s3 }
  0xc6   :  { %v463_v20 = vsub.f32 %v87_v0, %v97_v18  ;;  %v465_v21 = vsub.f32 %v121_v1, %v129_v19  ;;  %v116_v19 = vstv %s111_s4 }
  0xc7   :  { %v95_v22 = vpop.xlane.xlu0 %94  ;;  %v128_v23 = vpop.xlane.xlu1 %127 }
  0xc8   :  { %v98_v24 = vmul.f32 0.03125, %v95_v22  ;;  %v130_v25 = vmul.f32 0.03125, %v128_v23  ;;  %v101_v26 = vmul.f32 %v463_v20, %v463_v20  ;;  %v133_v27 = vmul.f32 %v465_v21, %v465_v21 }
  0xca   :  { %v471_v28 = vsub.f32 %v88_v2, %v98_v24  ;;  %v473_v29 = vsub.f32 %v122_v5, %v130_v25  ;;  %v103_v30 = vsel %vm89_vm0, %v101_v26, 0.0  ;;  %v135_v33 = vsel %vm89_vm0, %v133_v27, 0.0 }
  0xcb   :  { %104 = vadd.xlane.f32.xlu0 %v103_v30  ;;  %v159_v31 = vpop.xlane.xlu0 %158  ;;  %v162_v32 = vpop.xlane.xlu1 %161  ;;  %v182_v24 = vstv %s246_s15 }
  0xcc   :  { %v163_v34 = vmul.f32 0.03125, %v159_v31  ;;  %v164_v35 = vmul.f32 0.03125, %v162_v32  ;;  %v102_v36 = vmul.f32 %v471_v28, %v471_v28  ;;  %v134_v37 = vmul.f32 %v473_v29, %v473_v29 }
  0xce   :  { %v481_v38 = vsub.f32 %v155_v8, %v163_v34  ;;  %v483_v39 = vsub.f32 %v156_v9, %v164_v35  ;;  %v106_v40 = vsel %vm89_vm0, %v102_v36, 0.0  ;;  %v138_v43 = vsel %vm89_vm0, %v134_v37, 0.0 }
  0xcf   :  { %136 = vadd.xlane.f32.xlu0 %v135_v33  ;;  %107 = vadd.xlane.f32.xlu1 %v106_v40  ;;  %v193_v41 = vpop.xlane.xlu0 %192  ;;  %v196_v42 = vpop.xlane.xlu1 %195  ;;  %v216_v34 = vstv %s247_s16 }
  0xd0   :  { %v197_v44 = vmul.f32 0.03125, %v193_v41  ;;  %v198_v45 = vmul.f32 0.03125, %v196_v42  ;;  %v167_v46 = vmul.f32 %v481_v38, %v481_v38  ;;  %v168_v47 = vmul.f32 %v483_v39, %v483_v39 }
  0xd2   :  { %v491_v48 = vsub.f32 %v189_v12, %v197_v44  ;;  %v493_v49 = vsub.f32 %v190_v13, %v198_v45  ;;  %v169_v50 = vsel %vm89_vm0, %v167_v46, 0.0  ;;  %v172_v51 = vsel %vm89_vm0, %v168_v47, 0.0 }
  0xd3   :  { %139 = vadd.xlane.f32.xlu1 %v138_v43  ;;  %170 = vadd.xlane.f32.xlu0 %v169_v50 }
  0xd4   :  { %v201_v52 = vmul.f32 %v491_v48, %v491_v48  ;;  %v202_v53 = vmul.f32 %v493_v49, %v493_v49 }
  0xd6   :  { %v203_v54 = vsel %vm89_vm0, %v201_v52, 0.0  ;;  %v206_v55 = vsel %vm89_vm0, %v202_v53, 0.0 }
  0xd7   :  { %173 = vadd.xlane.f32.xlu1 %v172_v51  ;;  %204 = vadd.xlane.f32.xlu0 %v203_v54 }
  0xdb   :  { %207 = vadd.xlane.f32.xlu1 %v206_v55 }
 0x154   :  { %v105_v56 = vpop.xlane.xlu0 %104 }
 0x155   :  { %v109_v57 = vmul.f32 0.03125, %v105_v56 }
 0x157   :  { %v112_v60 = vadd.f32 1e-05, %v109_v57 }
 0x158   :  { %v108_v58 = vpop.xlane.xlu1 %107  ;;  %v137_v59 = vpop.xlane.xlu0 %136 }
 0x159   :  { %v110_v61 = vmul.f32 0.03125, %v108_v58  ;;  %v141_v62 = vmul.f32 0.03125, %v137_v59  ;;  %256 = vrsqrt.f32 %v112_v60 }
 0x15b   :  { %v144_v63 = vadd.f32 1e-05, %v141_v62  ;;  %v113_v0 = vadd.f32 1e-05, %v110_v61 }
 0x15c   :  { %v140_v1 = vpop.xlane.xlu1 %139  ;;  %v171_v2 = vpop.xlane.xlu0 %170 }
 0x15d   :  { %v142_v3 = vmul.f32 0.03125, %v140_v1  ;;  %v175_v4 = vmul.f32 0.03125, %v171_v2  ;;  %258 = vrsqrt.f32 %v144_v63 }
 0x15e   :  { %260 = vrsqrt.f32 %v113_v0 }
 0x15f   :  { %v145_v5 = vadd.f32 1e-05, %v142_v3  ;;  %v178_v6 = vadd.f32 1e-05, %v175_v4 }
 0x160   :  { %v174_v7 = vpop.xlane.xlu1 %173  ;;  %v205_v8 = vpop.xlane.xlu0 %204 }
 0x161   :  { %262 = vrsqrt.f32 %v145_v5  ;;  %v176_v9 = vmul.f32 0.03125, %v174_v7  ;;  %v209_v10 = vmul.f32 0.03125, %v205_v8 }
 0x162   :  { %264 = vrsqrt.f32 %v178_v6 }
 0x163   :  { %v179_v11 = vadd.f32 1e-05, %v176_v9  ;;  %v212_v12 = vadd.f32 1e-05, %v209_v10 }
 0x164   :  { %v208_v13 = vpop.xlane.xlu1 %207 }
 0x165   :  { %266 = vrsqrt.f32 %v179_v11  ;;  %v210_v14 = vmul.f32 0.03125, %v208_v13 }
 0x166   :  { %268 = vrsqrt.f32 %v212_v12  ;;  %v257_v17 = vpop.eup %256 }
 0x167   :  { %v213_v15 = vadd.f32 1e-05, %v210_v14  ;;  %v117_v26 = vmul.f32 %v257_v17, %v116_v19 }
 0x169   :  { %270 = vrsqrt.f32 %v213_v15  ;;  %v119_v36 = vmul.f32 %v117_v26, %v463_v20 }
 0x16a   :  { %v259_v18 = vpop.eup %258 }
 0x16b   :  { %v149_v22 = vmul.f32 %v259_v18, %v148_v16  ;;  %v261_v23 = vpop.eup %260 }
 0x16c   :  { %v118_v33 = vmul.f32 %v261_v23, %v116_v19 }
 0x16d   :  { %v151_v31 = vmul.f32 %v149_v22, %v465_v21 }
 0x16e   :  { %v263_v25 = vpop.eup %262  ;;  %v120_v45 = vmul.f32 %v118_v33, %v471_v28 }
 0x16f   :  { %v265_v27 = vpop.eup %264  ;;  %v150_v30 = vmul.f32 %v263_v25, %v148_v16  ;;  %v153_v43 = vadd.f32 %v151_v31, %v119_v36 }
 0x170   :  { %v183_v32 = vmul.f32 %v265_v27, %v182_v24 }
 0x171   :  { %v152_v41 = vmul.f32 %v150_v30, %v473_v29 }
 0x172   :  { %v267_v35 = vpop.eup %266  ;;  %v185_v37 = vmul.f32 %v183_v32, %v481_v38 }
 0x173   :  { %v269_v40 = vpop.eup %268  ;;  %v184_v42 = vmul.f32 %v267_v35, %v182_v24  ;;  %v154_v51 = vadd.f32 %v152_v41, %v120_v45 }
 0x174   :  { %v217_v44 = vmul.f32 %v269_v40, %v216_v34  ;;  %v187_v21 = vadd.f32 %v185_v37, %v153_v43 }
 0x175   :  { %v186_v46 = vmul.f32 %v184_v42, %v483_v39 }
 0x176   :  { %v271_v47 = vpop.eup %270  ;;  %v219_v50 = vmul.f32 %v217_v44, %v491_v48 }
 0x177   :  { %v218_v52 = vmul.f32 %v271_v47, %v216_v34  ;;  %v188_v20 = vadd.f32 %v186_v46, %v154_v51 }
 0x178   :  { %v221_v53 = vadd.f32 %v219_v50, %v187_v21 }
 0x179   :  { %v220_v38 = vmul.f32 %v218_v52, %v493_v49 }
 0x17a   :  { %223 = vst.msk [vmem:[#allocation12] sm:$0xff] %vm89_vm0, %v221_v53 }
 0x17b   :  { %v222_v29 = vadd.f32 %v220_v38, %v188_v20 }
 0x17d   :  { %224 = vst.msk [vmem:[#allocation12 + $0x8] sm:$0xff] %vm89_vm0, %v222_v29 }
 0x17e   :  { %371 = shalt.err (!%p368_p10)
}
 0x17f   :  { %236 = dma.vmem_to_hbm [thread:$0]  %s231_s18, 256, %s524_s5, [#allocation4], %s392_s23, %s392_s23, %s393_s24  }
 0x180   :  { %388 = dma.done.wait [#allocation4], 256  }
 0x181   :  { %389 = vsyncadd [#allocation4], 4294967040 }
 0x182   :  { %240 = vsyncpa [#allocation3], 1 }
 0x183   :  { %241 = vsyncpa [#allocation8], 1 }
 0x184   :  { %242 = vsyncpa [#allocation11], 1 }
 0x185   :  { %243 = vsyncpa [#allocation4], 1 }
 0x186   :  { %244 = vsyncpa [#allocation5], 1 }

</bundles_post_ra>
